<compile_context>
chip_gen: v6e
topology: v6e:2x2x1
jax: 0.10.0
libtpu: 0.0.40
codegen_flags: <defaults>
</compile_context>

<pallas_src>
import numpy as np
import jax
import jax.numpy as jnp
from jax import lax
from jax.experimental import pallas as pl
from jax.experimental.pallas import tpu as pltpu

# ---- module hyperparameters (synthetic, small) ----
POS_FEATURES = 16              # pos_features arg of PosEmbedding
FEAT = POS_FEATURES // 2       # self.pos_features: per-coordinate embedding width = 8
HALF = FEAT // 2               # half_dim inside sinusoidal_position_embedding = 4
NCOORD = 6                     # bounding-box coords: 6 * FEAT == POS_FEATURES * 3
CAT = NCOORD * FEAT            # MLP input width = pos_features * 3 = 48
OUT = 32                       # out_features
DIMS = 2                       # dimensions -> trailing singleton axes appended
B = 16                         # number of locations (batch) for the self-test


def _build_constant_tables():
    """Constant tables, built ONCE at module init (hoisted out of the kernel body).

    S[l, l*FEAT + j] = freq[j // 2], zero elsewhere   -> angle = location @ S
    phase[0, c]      = pi/2 on odd lanes              -> sin(x + pi/2) == cos(x)
    """
    k = np.arange(HALF, dtype=np.float64)
    freq = np.exp(-np.log(10000.0) * k / HALF).astype(np.float32)   # (HALF,)
    s_mat = np.zeros((NCOORD, CAT), np.float32)
    for l in range(NCOORD):
        for j in range(FEAT):
            s_mat[l, l * FEAT + j] = freq[j // 2]
    phase = np.zeros((1, CAT), np.float32)
    phase[0, 1::2] = np.float32(np.pi / 2)
    return jnp.asarray(s_mat), jnp.asarray(phase)


S_MAT, PHASE = _build_constant_tables()


def pos_embedding_kernel(loc_ref, s_ref, phase_ref, w1_ref, b1_ref, w2_ref, b2_ref,
                         out_ref):
    """Fused sinusoidal embedding (one matmul + one sin pass) + MLP."""
    # angle[b, l*FEAT + j] = loc[b, l] * freq[j // 2]  -- one tiny MXU matmul
    # against the resident block-diagonal frequency matrix (replaces 6
    # slice/broadcast passes + a lane-axis concat).
    ang = jnp.dot(loc_ref[...], s_ref[...],
                  preferred_element_type=jnp.float32,
                  precision=lax.Precision.HIGHEST)                  # (TB, CAT)

    # sin on even lanes, cos on odd lanes via sin(x + pi/2): single EUP pass.
    pe = jnp.sin(ang + phase_ref[...])                              # (TB, CAT)

    # MLP: Linear(CAT, OUT) -> ReLU -> Linear(OUT, OUT). MXU has huge slack at
    # these shapes, so HIGHEST precision is free and keeps f32 parity.
    h = jnp.dot(pe, w1_ref[...], preferred_element_type=jnp.float32,
                precision=lax.Precision.HIGHEST) + b1_ref[...]
    h = jnp.maximum(h, 0.0)
    y = jnp.dot(h, w2_ref[...], preferred_element_type=jnp.float32,
                precision=lax.Precision.HIGHEST) + b2_ref[...]
    out_ref[...] = y.astype(out_ref.dtype)                          # native 32 lanes


def _pick_block_rows(Bn):
    """Largest multiple-of-8 divisor of Bn up to 1024; >= 2 grid steps when Bn >= 16.

    Falling back to a single full block is layout-legal (block == full dim) and
    VMEM-safe on all generations now that the output tile is only 32 lanes wide.
    """
    cap = min(Bn, 1024)
    if Bn >= 16:
        cap = min(cap, Bn // 2)        # >= 2 grid steps -> engage both v7x TCs
    best = None
    for c in range(8, cap + 1, 8):
        if Bn % c == 0:
            best = c
    return best if best is not None else Bn


def pos_embedding(location, w1, b1, w2, b2, *, block_rows=None):
    """Wrapper: batched 1-D grid over rows; weights/constants resident at (0, 0)."""
    Bn = location.shape[0]
    if block_rows is None or Bn % block_rows != 0:
        block_rows = _pick_block_rows(Bn)
    grid = (Bn // block_rows,)

    flops = Bn * (2 * NCOORD * CAT + 2 * CAT * OUT + 2 * OUT * OUT)
    bytes_accessed = 4 * (Bn * NCOORD + Bn * OUT
                          + NCOORD * CAT + CAT + CAT * OUT + OUT + OUT * OUT + OUT)

    out = pl.pallas_call(
        pos_embedding_kernel,
        out_shape=jax.ShapeDtypeStruct((Bn, OUT), jnp.float32),
        grid=grid,
        in_specs=[
            pl.BlockSpec((block_rows, NCOORD), lambda i: (i, 0)),   # location tile
            pl.BlockSpec((NCOORD, CAT), lambda i: (0, 0)),          # S (resident)
            pl.BlockSpec((1, CAT), lambda i: (0, 0)),               # phase (resident)
            pl.BlockSpec((CAT, OUT), lambda i: (0, 0)),             # w1 (resident)
            pl.BlockSpec((1, OUT), lambda i: (0, 0)),               # b1
            pl.BlockSpec((OUT, OUT), lambda i: (0, 0)),             # w2 (resident)
            pl.BlockSpec((1, OUT), lambda i: (0, 0)),               # b2
        ],
        out_specs=pl.BlockSpec((block_rows, OUT), lambda i: (i, 0)),
        compiler_params=pltpu.CompilerParams(
            dimension_semantics=("parallel",)),      # v7x: shard batch over both TCs
        cost_estimate=pl.CostEstimate(
            flops=flops, transcendentals=Bn * CAT, bytes_accessed=bytes_accessed),
    )(location, S_MAT, PHASE, w1, b1, w2, b2)

    # embedding[(...,) + (None,) * dimensions]
    return out[(...,) + (None,) * DIMS]


def ref_forward(location, w1, b1, w2, b2):
    """Pure-JAX reference mirroring the PyTorch forward exactly (f32 math)."""
    k = jnp.arange(HALF, dtype=jnp.float32)
    freq = jnp.exp(jnp.log(10000.0) * -k / HALF)
    chunks = []
    for l in range(NCOORD):
        emb = location[:, l:l + 1] * freq[None, :]                  # (B, HALF)
        pe = jnp.zeros((location.shape[0], FEAT), jnp.float32)
        pe = pe.at[:, 2 * np.arange(HALF)].set(jnp.sin(emb))
        pe = pe.at[:, 2 * np.arange(HALF) + 1].set(jnp.cos(emb))
        chunks.append(pe)
    x = jnp.concatenate(chunks, axis=-1)
    h = jnp.maximum(
        jnp.dot(x, w1, precision=lax.Precision.HIGHEST) + b1[0], 0.0)
    y = jnp.dot(h, w2, precision=lax.Precision.HIGHEST) + b2[0]
    return y[(...,) + (None,) * DIMS]


if __name__ == "__main__":
    key = jax.random.PRNGKey(0)
    k_loc, k_w1, k_b1, k_w2, k_b2 = jax.random.split(key, 5)

    # Deterministic synthetic parameters (PyTorch Linear weight is (out,in); we store (in,out)).
    location = jax.random.uniform(k_loc, (B, NCOORD), jnp.float32, minval=0.0, maxval=64.0)
    w1 = jax.random.normal(k_w1, (CAT, OUT), jnp.float32) * (1.0 / np.sqrt(CAT))
    b1 = jax.random.normal(k_b1, (1, OUT), jnp.float32) * 0.01
    w2 = jax.random.normal(k_w2, (OUT, OUT), jnp.float32) * (1.0 / np.sqrt(OUT))
    b2 = jax.random.normal(k_b2, (1, OUT), jnp.float32) * 0.01

    out = jax.block_until_ready(pos_embedding(location, w1, b1, w2, b2))
    ref = jax.block_until_ready(ref_forward(location, w1, b1, w2, b2))

    assert out.shape == (B, OUT) + (1,) * DIMS, out.shape
    np.testing.assert_allclose(np.asarray(out), np.asarray(ref), rtol=1e-4, atol=1e-4)
    print("KERNEL_OK")
</pallas_src>

<mosaic_0001>
module attributes {stable_mosaic.version = 11 : i64} {
  func.func @pos_embedding_kernel(%arg0: i32, %arg1: memref<8x6xf32, #tpu.memory_space<vmem>>, %arg2: memref<6x48xf32, #tpu.memory_space<vmem>>, %arg3: memref<1x48xf32, #tpu.memory_space<vmem>>, %arg4: memref<48x32xf32, #tpu.memory_space<vmem>>, %arg5: memref<1x32xf32, #tpu.memory_space<vmem>>, %arg6: memref<32x32xf32, #tpu.memory_space<vmem>>, %arg7: memref<1x32xf32, #tpu.memory_space<vmem>>, %arg8: memref<8x32xf32, #tpu.memory_space<vmem>>) attributes {dimension_semantics = [#tpu.dimension_semantics<parallel>], iteration_bounds = array<i64: 2>, scalar_prefetch = 0 : i64, scratch_operands = 0 : i64, tpu.core_type = #tpu.core_type<tc>, window_params = [{transform_indices = @transform_0, window_bounds = array<i64: 8, 6>}, {pipeline_mode = #tpu.pipeline_mode<synchronous>, transform_indices = @transform_1, window_bounds = array<i64: 6, 48>}, {pipeline_mode = #tpu.pipeline_mode<synchronous>, transform_indices = @transform_2, window_bounds = array<i64: 1, 48>}, {pipeline_mode = #tpu.pipeline_mode<synchronous>, transform_indices = @transform_3, window_bounds = array<i64: 48, 32>}, {pipeline_mode = #tpu.pipeline_mode<synchronous>, transform_indices = @transform_4, window_bounds = array<i64: 1, 32>}, {pipeline_mode = #tpu.pipeline_mode<synchronous>, transform_indices = @transform_5, window_bounds = array<i64: 32, 32>}, {pipeline_mode = #tpu.pipeline_mode<synchronous>, transform_indices = @transform_6, window_bounds = array<i64: 1, 32>}, {transform_indices = @transform_7, window_bounds = array<i64: 8, 32>}]} {
    %c0 = arith.constant 0 : index
    %c0_0 = arith.constant 0 : index
    %0 = vector.load %arg1[%c0, %c0_0] : memref<8x6xf32, #tpu.memory_space<vmem>>, vector<8x6xf32>
    %c0_1 = arith.constant 0 : index
    %c0_2 = arith.constant 0 : index
    %1 = vector.load %arg2[%c0_1, %c0_2] : memref<6x48xf32, #tpu.memory_space<vmem>>, vector<6x48xf32>
    %cst = arith.constant dense<0.000000e+00> : vector<8x48xf32>
    %2 = tpu.matmul %0, %1, %cst {dimension_numbers = #tpu.dot_dimension_numbers<[1], [0], [0], [1], [0, 0, 1, 1], [], []>, precision = #tpu.contract_precision<fp32>} : vector<8x6xf32>, vector<6x48xf32>, vector<8x48xf32> -> vector<8x48xf32>
    %c0_3 = arith.constant 0 : index
    %c0_4 = arith.constant 0 : index
    %3 = vector.load %arg3[%c0_3, %c0_4] : memref<1x48xf32, #tpu.memory_space<vmem>>, vector<1x48xf32>
    %4 = vector.broadcast %3 : vector<1x48xf32> to vector<8x48xf32>
    %5 = arith.addf %2, %4 : vector<8x48xf32>
    %6 = math.sin %5 : vector<8x48xf32>
    %c0_5 = arith.constant 0 : index
    %c0_6 = arith.constant 0 : index
    %7 = vector.load %arg4[%c0_5, %c0_6] : memref<48x32xf32, #tpu.memory_space<vmem>>, vector<48x32xf32>
    %cst_7 = arith.constant dense<0.000000e+00> : vector<8x32xf32>
    %8 = tpu.matmul %6, %7, %cst_7 {dimension_numbers = #tpu.dot_dimension_numbers<[1], [0], [0], [1], [0, 0, 1, 1], [], []>, precision = #tpu.contract_precision<fp32>} : vector<8x48xf32>, vector<48x32xf32>, vector<8x32xf32> -> vector<8x32xf32>
    %c0_8 = arith.constant 0 : index
    %c0_9 = arith.constant 0 : index
    %9 = vector.load %arg5[%c0_8, %c0_9] : memref<1x32xf32, #tpu.memory_space<vmem>>, vector<1x32xf32>
    %10 = vector.broadcast %9 : vector<1x32xf32> to vector<8x32xf32>
    %11 = arith.addf %8, %10 : vector<8x32xf32>
    %cst_10 = arith.constant 0.000000e+00 : f32
    %12 = vector.broadcast %cst_10 : f32 to vector<8x32xf32>
    %13 = arith.maximumf %11, %12 : vector<8x32xf32>
    %c0_11 = arith.constant 0 : index
    %c0_12 = arith.constant 0 : index
    %14 = vector.load %arg6[%c0_11, %c0_12] : memref<32x32xf32, #tpu.memory_space<vmem>>, vector<32x32xf32>
    %cst_13 = arith.constant dense<0.000000e+00> : vector<8x32xf32>
    %15 = tpu.matmul %13, %14, %cst_13 {dimension_numbers = #tpu.dot_dimension_numbers<[1], [0], [0], [1], [0, 0, 1, 1], [], []>, precision = #tpu.contract_precision<fp32>} : vector<8x32xf32>, vector<32x32xf32>, vector<8x32xf32> -> vector<8x32xf32>
    %c0_14 = arith.constant 0 : index
    %c0_15 = arith.constant 0 : index
    %16 = vector.load %arg7[%c0_14, %c0_15] : memref<1x32xf32, #tpu.memory_space<vmem>>, vector<1x32xf32>
    %17 = vector.broadcast %16 : vector<1x32xf32> to vector<8x32xf32>
    %18 = arith.addf %15, %17 : vector<8x32xf32>
    %c0_16 = arith.constant 0 : index
    %c0_17 = arith.constant 0 : index
    %19 = vector.load %arg8[%c0_16, %c0_17] : memref<8x32xf32, #tpu.memory_space<vmem>>, vector<8x32xf32>
    tpu.vector_store %arg8[%c0_16, %c0_17], %18 {strides = array<i32>} : memref<8x32xf32, #tpu.memory_space<vmem>>, vector<8x32xf32>,
    return
  }
  func.func @transform_0(%arg0: i32) -> (i32, i32) {
    %c0_i32 = arith.constant 0 : i32
    %c0_i32_0 = arith.constant 0 : i32
    return %arg0, %c0_i32 : i32, i32
  }
  func.func @transform_1(%arg0: i32) -> (i32, i32) {
    %c0_i32 = arith.constant 0 : i32
    %c0_i32_0 = arith.constant 0 : i32
    %c0_i32_1 = arith.constant 0 : i32
    return %c0_i32, %c0_i32_0 : i32, i32
  }
  func.func @transform_2(%arg0: i32) -> (i32, i32) {
    %c0_i32 = arith.constant 0 : i32
    %c0_i32_0 = arith.constant 0 : i32
    %c0_i32_1 = arith.constant 0 : i32
    return %c0_i32, %c0_i32_0 : i32, i32
  }
  func.func @transform_3(%arg0: i32) -> (i32, i32) {
    %c0_i32 = arith.constant 0 : i32
    %c0_i32_0 = arith.constant 0 : i32
    %c0_i32_1 = arith.constant 0 : i32
    return %c0_i32, %c0_i32_0 : i32, i32
  }
  func.func @transform_4(%arg0: i32) -> (i32, i32) {
    %c0_i32 = arith.constant 0 : i32
    %c0_i32_0 = arith.constant 0 : i32
    %c0_i32_1 = arith.constant 0 : i32
    return %c0_i32, %c0_i32_0 : i32, i32
  }
  func.func @transform_5(%arg0: i32) -> (i32, i32) {
    %c0_i32 = arith.constant 0 : i32
    %c0_i32_0 = arith.constant 0 : i32
    %c0_i32_1 = arith.constant 0 : i32
    return %c0_i32, %c0_i32_0 : i32, i32
  }
  func.func @transform_6(%arg0: i32) -> (i32, i32) {
    %c0_i32 = arith.constant 0 : i32
    %c0_i32_0 = arith.constant 0 : i32
    %c0_i32_1 = arith.constant 0 : i32
    return %c0_i32, %c0_i32_0 : i32, i32
  }
  func.func @transform_7(%arg0: i32) -> (i32, i32) {
    %c0_i32 = arith.constant 0 : i32
    %c0_i32_0 = arith.constant 0 : i32
    return %arg0, %c0_i32 : i32, i32
  }
}

</mosaic_0001>

<bundles_post_ra>
// kernel: tpu_custom_call.1
= control target key start
LH: loop header
LB: loop body
LE: loop exit
PB: predicated region body
PF: predicated region fallthrough
CT: control target
= control target key end

     0   :  { %12 = vsyncpa [#allocation3], 0  ;;  %s2801_s0 = inlined_call_operand.vmem [shape: f32[16,6], index: 0, kind: input, shape index: {}]   ;;  %s2802_s1 = inlined_call_operand.vmem [shape: f32[6,48], index: 1, kind: input, shape index: {}]   ;;  %s2803_s2 = inlined_call_operand.vmem [shape: f32[1,48], index: 2, kind: input, shape index: {}]   ;;  %s2804_s3 = inlined_call_operand.vmem [shape: f32[48,32], index: 3, kind: input, shape index: {}]   ;;  %s2805_s4 = inlined_call_operand.vmem [shape: f32[1,32], index: 4, kind: input, shape index: {}]   ;;  %s2806_s5 = inlined_call_operand.vmem [shape: f32[32,32], index: 5, kind: input, shape index: {}]   ;;  %s2807_s6 = inlined_call_operand.vmem [shape: f32[1,32], index: 6, kind: input, shape index: {}]   ;;  %s2808_s7 = inlined_call_operand.hbm [shape: f32[16,32], index: 7, kind: output, shape index: {}]  }
   0x1   :  { %14 = vsyncpa [#allocation3 + $0x1], 0  ;;  %s2397_s24 = smov 0   ;;  %s2399_s25 = smov 0  }
   0x2   :  { %s2401_s26 = smov 0   ;;  %s2403_s27 = smov 0  }
   0x3 LB: > { %s2418_s28 = sadd.s32 4294967295, %s2346_s27   ;;  %s1944_s29 = sadd.s32 4294967294, %s2346_s27   ;;  %s2346_s27 = sphi %s2403_s27, %s2814_s27   ;;  %s2342_s26 = sphi %s2401_s26, %s2813_s26   ;;  %s2338_s25 = sphi %s2399_s25, %s2812_s25   ;;  %s2334_s24 = sphi %s2397_s24, %s2811_s24  }
   0x4   : > { %s2422_s30 = sadd.s32 1, %s2346_s27   ;;  %s179_s8 = sadd.s32 1, %s2342_s26 }
   0x5   : > { %s176_s9 = ssub.s32 %s2346_s27, %s2422_s30  ;;  %p189_p0 = scmp.ne.s32.totalorder %s2342_s26, %s2338_s25 }
   0x6   : > { %p177_p1 = scmp.eq.s32.totalorder %s176_s9, 0  ;;  %p190_p2 = scmp.eq.s32.totalorder %s2418_s28, 1 }
   0x7   : > { %p195_p3 = scmp.ne.s32.totalorder %s2338_s25, %s2334_s24  ;;  %p196_p4 = scmp.eq.s32.totalorder %s1944_s29, 1 }
   0x8   : > { %s2433_s10 = scalar_select %p177_p1, %s2342_s26, %s179_s8  }
   0x9   : > { %p2435_p5 = por %p190_p2, %p189_p0  ;;  %p2439_p6 = por %p196_p4, %p195_p3 }
   0xa   : > { %p1947_p7 = scmp.ge.s32.totalorder %s2346_s27, 1  ;;  %p239_p8 = scmp.lt.s32.totalorder %s2346_s27, 3 }
   0xc   : > { %p240_p9 = pnand %p1947_p7, %p239_p8 }
   0xd   : > { %p270_p10 = scmp.lt.s32.totalorder (!%p240_p9), %s2418_s28, 1  ;;  %s267_s18 = sand.u32 (!%p240_p9), 1, %s2338_s25  }
   0xe   : > { %243 = sbr.rel (%p240_p9) target bundleno = 797 (0x31d), region = 48  ;;  %s1958_s20 = sshll.u32 (!%p240_p9), %s2418_s28, 7 }
   0xf   : > { %s1883_s8 = scalar_lea.hbm (!%p240_p9), %s2808_s7, %s1958_s20  ;;  %s1872_s9 = scalar_lea.sflag (!%p240_p9), [#allocation3], %s267_s18 }
  0x10   : > { %s2356_s14 = smov (!%p240_p9), [#allocation2]  }
  0x13   : > { %v275_v0 = vld [vmem:[%s2802_s1] sm:$0x3f]  ;;  %vm287_vm0 = vcmask 1045504   ;;  %v2348_v1 = vmov 0.0   ;;  %vm2349_vm1 = vmmov 0   ;;  %s271_s15 = scalar_select %p270_p10, %s2418_s28, 1 }
  0x14   : > { %2045 = vmatprep.subr.mxu0 %v2348_v1  ;;  %v289_v2 = vsel %vm287_vm0, %v275_v0, 0  ;;  %2050 = vmatprep.subr.mxu1 %v2348_v1  ;;  %vm283_vm2 = vcmask 48128   ;;  %v846_v15 = vld [vmem:[%s2804_s3 + $0x28] sm:$0xff]  ;;  %v845_v16 = vld [vmem:[%s2804_s3 + $0x20] sm:$0xff]  ;;  %v844_v17 = vld [vmem:[%s2804_s3 + $0x18] sm:$0xff]  ;;  %vm854_vm15 = vcmask 392192  }
  0x15   : > { %v322_v3 = vand.u32 4294901760, %v289_v2  ;;  %2047 = vmatprep.mubr.msk.f32.mxu0 %vm2349_vm1, %v2348_v1  ;;  %2052 = vmatprep.mubr.msk.f32.mxu1 %vm2349_vm1, %v2348_v1  ;;  %s1949_s16 = sshll.u32 %s271_s15, 3  ;;  %v2486_v18 = vand.u32 4294901760, %v846_v15  ;;  %v2488_v19 = vand.u32 4294901760, %v845_v16  ;;  %v2490_v20 = vand.u32 4294901760, %v844_v17  ;;  %v843_v21 = vld [vmem:[%s2804_s3 + $0x10] sm:$0xff] }
  0x16   : > { %s273_s19 = scalar_lea.vmem %s2801_s0, %s1949_s16  ;;  %v842_v22 = vld [vmem:[%s2804_s3 + $0x8] sm:$0xff]  ;;  %v841_v23 = vld [vmem:[%s2804_s3] sm:$0xff]  ;;  %v2501_v24 = vand.u32 4294901760, %v843_v21  ;;  %s2290_s28 = sshll.u32 %s2356_s14, 4  ;;  %s2291_s28 = int_to_ptr.vmem [resolvable:$false] %s2290_s28 }
  0x17   : > { %2046 = vmatpush3.msra.mxu0 %v322_v3  ;;  %v399_v4 = vsub.f32 %v289_v2, %v322_v3  ;;  %v274_v6 = vld [vmem:[%s273_s19] sm:$0xff]  ;;  %v2503_v25 = vand.u32 4294901760, %v842_v22  ;;  %v2505_v26 = vand.u32 4294901760, %v841_v23  ;;  %v2508_v27 = vsub.f32 %v846_v15, %v2486_v18  ;;  %s1948_s19 = sshll.u32 %s267_s18, 3  ;;  %s2292_s15 = scalar_lea.vmem %s2291_s28, 256 }
  0x18   : > { %2055 = vmatprep.subr.mxu0 %v2348_v1  ;;  %v285_v7 = vsel %vm283_vm2, %v274_v6, 0  ;;  %v2511_v28 = vsub.f32 %v845_v16, %v2488_v19  ;;  %v2514_v29 = vsub.f32 %v844_v17, %v2490_v20  ;;  %v2518_v30 = vsub.f32 %v843_v21, %v2501_v24  ;;  %v1950_v53 = vld [vmem:[%s2803_s2] ss:$0 sm:$0xff]  ;;  %s269_s21 = scalar_lea.vmem [#allocation2], %s1948_s19 }
  0x19   : > { %v400_v5 = vand.u32 4294901760, %v399_v4  ;;  %v357_v9 = vand.u32 4294901760, %v285_v7  ;;  %v2521_v31 = vsub.f32 %v842_v22, %v2503_v25  ;;  %v962_v32 = vand.u32 4294901760, %v2508_v27  ;;  %s1885_s22 = sshll.u32 %s269_s21, 4  ;;  %s1886_s22 = int_to_ptr.vmem [resolvable:$true] %s1885_s22 }
  0x1a   : > { %v969_v33 = vand.u32 4294901760, %v2511_v28  ;;  %v976_v34 = vand.u32 4294901760, %v2514_v29  ;;  %v2529_v35 = vsub.f32 %v841_v23, %v2505_v26  ;;  %v983_v36 = vand.u32 4294901760, %v2518_v30  ;;  %s2286_s13 = scalar_lea.vmem %s1886_s22, 128  ;;  %p2293_p0 = scmp.lt.s32.totalorder %s1886_s22, %s2291_s28 }
  0x1b   : > { %v401_v8 = vsub.f32 %v399_v4, %v400_v5  ;;  %v358_v11 = vsub.f32 %v285_v7, %v357_v9  ;;  %v963_v37 = vsub.f32 %v2508_v27, %v962_v32  ;;  %v990_v40 = vand.u32 4294901760, %v2521_v31  ;;  %p2287_p11 = scmp.ne.s32.totalorder %s1886_s22, %s2286_s13  ;;  %p2294_p1 = scmp.lt.s32.totalorder %s2292_s15, %s2286_s13 }
  0x1c   : > { %v970_v38 = vsub.f32 %v2511_v28, %v969_v33  ;;  %v977_v39 = vsub.f32 %v2514_v29, %v976_v34  ;;  %v984_v43 = vsub.f32 %v2518_v30, %v983_v36  ;;  %v997_v44 = vand.u32 4294901760, %v2529_v35 }
  0x1d   : > { %v402_v10 = vand.u32 4294901760, %v401_v8  ;;  %v359_v12 = vand.u32 4294901760, %v358_v11  ;;  %v964_v41 = vand.u32 4294901760, %v963_v37  ;;  %v991_v46 = vsub.f32 %v2521_v31, %v990_v40  ;;  %p2288_p12 = pnand %p2287_p11, %p2435_p5  ;;  %p2295_p2 = por %p2294_p1, %p2293_p0 }
  0x1e   : > { %v971_v42 = vand.u32 4294901760, %v970_v38  ;;  %v978_v45 = vand.u32 4294901760, %v977_v39  ;;  %v985_v47 = vand.u32 4294901760, %v984_v43  ;;  %v998_v48 = vsub.f32 %v2529_v35, %v997_v44 }
  0x1f   : > { %2051 = vmatpush3.msra.mxu1 %v402_v10  ;;  %v360_v13 = vsub.f32 %v358_v11, %v359_v12  ;;  %v992_v49 = vand.u32 4294901760, %v991_v46  ;;  %v2350_v17 = vmov 683565275   ;;  %v2351_v22 = vmov 2475754826   ;;  %p2289_p13 = pneg %p2288_p12 }
  0x20   : > { %2053 = vmatmul.mubr.f32.vlgmr.msra.gmra.mxu1 %v357_v9  ;;  %2060 = vmatprep.subr.mxu1 %v2348_v1  ;;  %v999_v50 = vand.u32 4294901760, %v998_v48  ;;  %v2352_v38 = vmov 2131351028   ;;  %v2354_v46 = vmov 920167782   ;;  %vm1381_vm2 = vcmask 261120  }
  0x21   : > { %2061 = vmatpush3.msra.mxu1 %v322_v3  ;;  %2062 = vmatprep.mubr.msk.f32.mxu1 %vm2349_vm1, %v2348_v1  ;;  %v361_v14 = vand.u32 4294901760, %v360_v13  ;;  %p2296_p3 = pnand %p2295_p2, %p2289_p13 }
  0x22   : > { %2070 = vmatprep.subr.mxu1 %v2348_v1 }
  0x23   : > { %2048 = vmatmul.mubr.f32.vlgmr.msra.gmra.mxu0 %v361_v14 }
  0x24   : > { %2063 = vmatmul.mubr.f32.vlgmr.msra.gmra.mxu1 %v359_v12  ;;  %2056 = vmatpush3.msra.mxu0 %v399_v4 }
  0x25   : > { %2071 = vmatpush3.msra.mxu1 %v322_v3  ;;  %2057 = vmatprep.mubr.msk.f32.mxu0 %vm2349_vm1, %v2348_v1 }
  0x26   : > { %2065 = vmatprep.subr.mxu0 %v2348_v1  ;;  %2072 = vmatprep.mubr.msk.f32.mxu1 %vm2349_vm1, %v2348_v1 }
  0x27   : > { %2090 = vmatprep.subr.mxu1 %v2348_v1  ;;  %2058 = vmatmul.mubr.f32.vlgmr.msra.gmra.mxu0 %v358_v11 }
  0x28   : > { %2073 = vmatmul.mubr.f32.vlgmr.msra.gmra.mxu1 %v357_v9  ;;  %2066 = vmatpush3.msra.mxu0 %v400_v5 }
  0x29   : > { %2102 = vmatprep.mubr.msk.f32.mxu1 %vm2349_vm1, %v2348_v1  ;;  %2067 = vmatprep.mubr.msk.f32.mxu0 %vm2349_vm1, %v2348_v1 }
  0x2a   : > { %2075 = vmatprep.subr.mxu0 %v2348_v1  ;;  %2091 = vmatpush3.msra.mxu1 %v964_v41 }
  0x2b   : > { %2068 = vmatmul.mubr.f32.vlgmr.msra.gmra.mxu0 %v357_v9  ;;  %2092 = vmatprep.subr.mxu1 %v2348_v1 }
  0x2c   : > { %2087 = vmatprep.mubr.msk.f32.mxu0 %vm2349_vm1, %v2348_v1  ;;  %2076 = vmatpush3.msra.mxu0 %v2486_v18 }
  0x2d   : > { %2077 = vmatprep.subr.mxu0 %v2348_v1  ;;  %2093 = vmatpush3.msra.mxu1 %v971_v42  ;;  %v2353_v42 = vmov 2102212464  }
  0x2e   : > { %2078 = vmatpush3.msra.mxu0 %v2488_v19  ;;  %2094 = vmatprep.subr.mxu1 %v2348_v1 }
  0x2f   : > { %2079 = vmatprep.subr.mxu0 %v2348_v1  ;;  %2095 = vmatpush3.msra.mxu1 %v978_v45 }
  0x30   : > { %2080 = vmatpush3.msra.mxu0 %v2490_v20  ;;  %2096 = vmatprep.subr.mxu1 %v2348_v1 }
  0x31   : > { %2081 = vmatprep.subr.mxu0 %v2348_v1  ;;  %2097 = vmatpush3.msra.mxu1 %v985_v47 }
  0x32   : > { %2082 = vmatpush3.msra.mxu0 %v2501_v24  ;;  %2098 = vmatprep.subr.mxu1 %v2348_v1 }
  0x33   : > { %2083 = vmatprep.subr.mxu0 %v2348_v1  ;;  %2099 = vmatpush3.msra.mxu1 %v992_v49  ;;  %v2355_v49 = vmov 1326507024  }
  0x34   : > { %2084 = vmatpush3.msra.mxu0 %v2503_v25  ;;  %2100 = vmatprep.subr.mxu1 %v2348_v1 }
  0x35   : > { %2085 = vmatprep.subr.mxu0 %v2348_v1  ;;  %2101 = vmatpush3.msra.mxu1 %v999_v50 }
  0x36   : > { %2086 = vmatpush3.msra.mxu0 %v2505_v26  ;;  %2120 = vmatprep.subr.mxu1 %v2348_v1 }
  0x37   : > { %2105 = vmatprep.subr.mxu0 %v2348_v1 }
  0xe0   : > { %v439_v51 = vpop.f32.mrf.mxu1 }
  0xe2   : > { %v2054_v52 = vpop.f32.mrf.mxu1 }
  0xe3   : > { %v363_v55 = vpop.f32.mrf.mxu0 }
  0xe4   : > { %v587_v54 = vpop.f32.mrf.mxu1  ;;  %v364_v56 = vadd.f32 %v1950_v53, %v363_v55 }
  0xe5   : > { %v2049_v58 = vpop.f32.mrf.mxu0 }
  0xe6   : > { %v2064_v57 = vpop.f32.mrf.mxu1  ;;  %v440_v59 = vadd.f32 %v439_v51, %v364_v56 }
  0xe7   : > { %v513_v61 = vpop.f32.mrf.mxu0 }
  0xe8   : > { %v733_v60 = vpop.f32.mrf.mxu1  ;;  %v514_v62 = vadd.f32 %v513_v61, %v440_v59 }
  0xe9   : > { %v2059_v0 = vpop.f32.mrf.mxu0 }
  0xea   : > { %v2074_v63 = vpop.f32.mrf.mxu1  ;;  %v588_v2 = vadd.f32 %v587_v54, %v514_v62 }
  0xeb   : > { %v661_v3 = vpop.f32.mrf.mxu0 }
  0xec   : > { %v662_v4 = vadd.f32 %v661_v3, %v588_v2 }
  0xed   : > { %v2069_v5 = vpop.f32.mrf.mxu0 }
  0xee   : > { %v2570_v6 = vadd.f32 %v733_v60, %v662_v4 }
  0xf0   : > { %v740_v7 = vand.u32 2139095040, %v2570_v6  ;;  %v737_v11 = vand.u32 2147483647, %v2570_v6  ;;  %vm739_vm10 = vcmp.lt.s32.totalorder %v2570_v6, 0  ;;  %vm829_vm0 = vweird.f32 %v2570_v6 }
  0xf2   : > { %v741_v8 = vshrl.u32 %v740_v7, 23  ;;  %v744_v14 = vand.u32 8388607, %v737_v11  ;;  %vm738_vm11 = vcmp.le.f32.partialorder %v737_v11, 0.7853982 }
  0xf4   : > { %v1951_v9 = vadd.s32 4294967169, %v741_v8  ;;  %v745_v51 = vor.u32 8388608, %v744_v14 }
  0xf6   : > { %v747_v10 = vadd.s32 1, %v1951_v9  ;;  %v785_v2 = vshll.u32 %v745_v51, 8 }
  0xf8   : > { %vm748_vm3 = vcmp.gt.s32.totalorder %v747_v10, 0 }
  0xf9   : > { %v749_v12 = vsel %vm748_vm3, %v747_v10, 0 }
  0xfa   : > { %v751_v13 = vand.u32 31, %v749_v12  ;;  %v750_v16 = vshrl.u32 %v749_v12, 5 }
  0xfc   : > { %v752_v15 = vsub.s32 32, %v751_v13  ;;  %v754_v21 = vshll.u32 %v2350_v17, %v751_v13  ;;  %v757_v23 = vshll.u32 %v2351_v22, %v751_v13  ;;  %v760_v41 = vshll.u32 %v2352_v38, %v751_v13 }
  0xfd   : > { %v763_v45 = vshll.u32 %v2353_v42, %v751_v13  ;;  %v766_v48 = vshll.u32 %v2354_v46, %v751_v13  ;;  %vm769_vm4 = vcmp.lt.s32.totalorder %v750_v16, 1  ;;  %vm772_vm5 = vcmp.lt.s32.totalorder %v750_v16, 4 }
  0xfe   : > { %v755_v37 = vshrl.u32 %v2351_v22, %v752_v15  ;;  %v758_v39 = vshrl.u32 %v2352_v38, %v752_v15  ;;  %v761_v43 = vshrl.u32 %v2353_v42, %v752_v15  ;;  %v764_v47 = vshrl.u32 %v2354_v46, %v752_v15 }
  0xff   : > { %v767_v50 = vshrl.u32 %v2355_v49, %v752_v15  ;;  %v753_v60 = vshrl.u32 %v2350_v17, %v752_v15  ;;  %vm771_vm6 = vcmp.lt.s32.totalorder %v750_v16, 3  ;;  %vm770_vm7 = vcmp.lt.s32.totalorder %v750_v16, 2 }
 0x100   : > { %v756_v52 = vor.u32 %v755_v37, %v754_v21  ;;  %v759_v53 = vor.u32 %v758_v39, %v757_v23  ;;  %v762_v54 = vor.u32 %v761_v43, %v760_v41  ;;  %v765_v55 = vor.u32 %v764_v47, %v763_v45 }
 0x101   : > { %v768_v56 = vor.u32 %v767_v50, %v766_v48 }
 0x102   : > { %v774_v57 = vsel %vm772_vm5, %v762_v54, 2102212464  ;;  %v777_v58 = vsel %vm769_vm4, %v756_v52, %v759_v53  ;;  %v781_v59 = vsel %vm769_vm4, %v759_v53, %v762_v54  ;;  %v778_v61 = vsel %vm772_vm5, %v765_v55, 920167782 }
 0x103   : > { %v782_v62 = vsel %vm772_vm5, %v768_v56, 1326507024  ;;  %v779_v63 = vsel %vm771_vm6, %v762_v54, %v778_v61  ;;  %v773_v3 = vsel %vm769_vm4, %v753_v60, %v756_v52  ;;  %v775_v4 = vsel %vm771_vm6, %v759_v53, %v774_v57 }
 0x104   : > { %v783_v0 = vsel %vm771_vm6, %v765_v55, %v782_v62  ;;  %v780_v5 = vsel %vm770_vm7, %v777_v58, %v779_v63  ;;  %v776_v13 = vsel %vm770_vm7, %v773_v3, %v775_v4 }
 0x105   : > { %v784_v7 = vsel %vm770_vm7, %v781_v59, %v783_v0  ;;  %v2579_v10 = vmul.u32.u64.low %v785_v2, %v780_v5  ;;  %v2580_v12 = vmul.u32.u64.high %v785_v2, %v780_v5, %v2579_v10  ;;  %v792_v15 = vmul.u32 %v785_v2, %v776_v13 }
 0x106   : > { %v2576_v8 = vmul.u32.u64.low %v785_v2, %v784_v7  ;;  %v2577_v9 = vmul.u32.u64.high %v785_v2, %v784_v7, %v2576_v8 }
 0x107   : > { %v795_v14 = vadd.s32 1, %v2580_v12 }
 0x108   : > { %vm794_vm8 = vc.u32 %v2577_v9, %v2579_v10  ;;  %v793_v45 = vadd.s32 %v2579_v10, %v2577_v9 }
 0x109   : > { %v796_v16 = vsel %vm794_vm8, %v795_v14, %v2580_v12 }
 0x10a   : > { %v797_v17 = vadd.s32 %v796_v16, %v792_v15 }
 0x10c   : > { %v798_v21 = vadd.s32 536870912, %v797_v17 }
 0x10e   : > { %v799_v22 = vshrl.u32 %v798_v21, 30 }
 0x110   : > { %v800_v23 = vshll.u32 %v799_v22, 30  ;;  %v823_v58 = vsub.s32 4, %v799_v22 }
 0x112   : > { %v801_v37 = vsub.s32 %v797_v17, %v800_v23  ;;  %v824_v61 = vsel %vm739_vm10, %v823_v58, %v799_v22 }
 0x113   : > { %v826_v62 = vsel %vm738_vm11, 0, %v824_v61 }
 0x114   : > { %v803_v38 = vsub.s32 0, %v801_v37  ;;  %v830_v63 = vadd.s32 3, %v826_v62 }
 0x116   : > { %v1952_v39 = vmin.u32 %v803_v38, %v801_v37  ;;  %v831_v0 = vand.u32 3, %v830_v63 }
 0x118   : > { %v805_v41 = vclz %v1952_v39  ;;  %vm836_vm12 = vcmp.eq.s32.totalorder %v831_v0, 2  ;;  %vm833_vm13 = vcmp.eq.s32.totalorder %v831_v0, 0  ;;  %vm832_vm14 = vcmp.lt.s32.totalorder %v831_v0, 2 }
 0x11a   : > { %v1953_v42 = vadd.s32 4294967294, %v805_v41 }
 0x11c   : > { %vm1954_vm9 = vcmp.lt.s32.totalorder %v1953_v42, 0 }
 0x11d   : > { %v808_v43 = vsel %vm1954_vm9, 0, %v1953_v42 }
 0x11e   : > { %v809_v46 = vsub.s32 32, %v808_v43  ;;  %v813_v47 = vsub.s32 4294967266, %v808_v43  ;;  %v810_v48 = vshll.u32 %v801_v37, %v808_v43 }
 0x120   : > { %v811_v49 = vshrl.u32 %v793_v45, %v809_v46  ;;  %v814_v50 = vadd.s32 127, %v813_v47  ;;  %v1955_v46 = vld [vmem:[%s2805_s4] ss:$0 sm:$0xff] }
 0x122   : > { %v812_v51 = vor.u32 %v811_v49, %v810_v48  ;;  %v815_v52 = vshll.u32 %v814_v50, 23 }
 0x124   : > { %v816_v53 = vor.u32 4788187, %v815_v52  ;;  %v819_v55 = vcvt.s32.f32 %v812_v51 }
 0x126   : > { %v817_v54 = vand.u32 2147483647, %v816_v53 }
 0x128   : > { %v820_v56 = vmul.f32 %v819_v55, %v817_v54 }
 0x12a   : > { %v821_v57 = vxor.u32 2147483648, %v820_v56 }
 0x12c   : > { %v822_v59 = vsel %vm739_vm10, %v821_v57, %v820_v56 }
 0x12d   : > { %v825_v60 = vsel %vm738_vm11, %v2570_v6, %v822_v59 }
 0x12e   : > { %2282 = vcosq.f32 %v825_v60 }
 0x12f   : > { %2284 = vsinq.f32 %v825_v60 }
 0x13b   : > { %v2283_v2 = vpop.eup %2282 }
 0x13c   : > { %v2285_v3 = vpop.eup %2284  ;;  %v837_v4 = vxor.u32 2147483648, %v2283_v2 }
 0x13d   : > { %v834_v5 = vxor.u32 2147483648, %v2285_v3 }
 0x13e   : > { %v838_v7 = vsel %vm836_vm12, %v837_v4, %v2285_v3 }
 0x13f   : > { %v835_v8 = vsel %vm833_vm13, %v2283_v2, %v834_v5 }
 0x140   : > { %v839_v11 = vsel %vm832_vm14, %v835_v8, %v838_v7 }
 0x141   : > { %v840_v9 = vsel %vm829_vm0, nan, %v839_v11 }
 0x142   : > { %v856_v10 = vsel %vm854_vm15, %v840_v9, 0  ;;  %v1956_v9 = vld [vmem:[%s2807_s6] ss:$0 sm:$0xff] }
 0x143   : > { %v929_v12 = vand.u32 4294901760, %v856_v10 }
 0x145   : > { %v930_v13 = vsub.f32 %v856_v10, %v929_v12  ;;  %2103 = vmatmul.mubr.f32.vlgmr.msra.gmra.mxu1 %v929_v12 }
 0x146   : > { %2121 = vmatpush3.msra.mxu1 %v2486_v18  ;;  %2132 = vmatprep.mubr.msk.f32.mxu1 %vm2349_vm1, %v2348_v1 }
 0x147   : > { %2122 = vmatprep.subr.mxu1 %v2348_v1  ;;  %v931_v14 = vand.u32 4294901760, %v930_v13 }
 0x148   : > { %2123 = vmatpush3.msra.mxu1 %v2488_v19 }
 0x149   : > { %2124 = vmatprep.subr.mxu1 %v2348_v1  ;;  %v932_v15 = vsub.f32 %v930_v13, %v931_v14 }
 0x14a   : > { %2125 = vmatpush3.msra.mxu1 %v2490_v20 }
 0x14b   : > { %2126 = vmatprep.subr.mxu1 %v2348_v1  ;;  %v933_v6 = vand.u32 4294901760, %v932_v15 }
 0x14c   : > { %2127 = vmatpush3.msra.mxu1 %v2501_v24 }
 0x14d   : > { %2128 = vmatprep.subr.mxu1 %v2348_v1  ;;  %2088 = vmatmul.mubr.f32.vlgmr.msra.gmra.mxu0 %v933_v6 }
 0x14e   : > { %2106 = vmatpush3.msra.mxu0 %v2508_v27  ;;  %2129 = vmatpush3.msra.mxu1 %v2503_v25 }
 0x14f   : > { %2107 = vmatprep.subr.mxu0 %v2348_v1  ;;  %2130 = vmatprep.subr.mxu1 %v2348_v1 }
 0x150   : > { %2108 = vmatpush3.msra.mxu0 %v2511_v28  ;;  %2131 = vmatpush3.msra.mxu1 %v2505_v26 }
 0x151   : > { %2109 = vmatprep.subr.mxu0 %v2348_v1  ;;  %2133 = vmatmul.mubr.f32.vlgmr.msra.gmra.mxu1 %v931_v14 }
 0x152   : > { %2150 = vmatprep.subr.mxu1 %v2348_v1  ;;  %2110 = vmatpush3.msra.mxu0 %v2514_v29 }
 0x153   : > { %2151 = vmatpush3.msra.mxu1 %v2486_v18  ;;  %2111 = vmatprep.subr.mxu0 %v2348_v1  ;;  %v1373_v18 = vld [vmem:[%s2806_s5 + $0x18] sm:$0xff] }
 0x154   : > { %2152 = vmatprep.subr.mxu1 %v2348_v1  ;;  %2112 = vmatpush3.msra.mxu0 %v2518_v30  ;;  %v1370_v30 = vld [vmem:[%s2806_s5] sm:$0xff] }
 0x155   : > { %2153 = vmatpush3.msra.mxu1 %v2488_v19  ;;  %2113 = vmatprep.subr.mxu0 %v2348_v1  ;;  %v2660_v19 = vand.u32 4294901760, %v1373_v18 }
 0x156   : > { %2154 = vmatprep.subr.mxu1 %v2348_v1  ;;  %2114 = vmatpush3.msra.mxu0 %v2521_v31 }
 0x157   : > { %2155 = vmatpush3.msra.mxu1 %v2490_v20  ;;  %2115 = vmatprep.subr.mxu0 %v2348_v1  ;;  %v1372_v20 = vld [vmem:[%s2806_s5 + $0x10] sm:$0xff] }
 0x158   : > { %2156 = vmatprep.subr.mxu1 %v2348_v1  ;;  %2116 = vmatpush3.msra.mxu0 %v2529_v35 }
 0x159   : > { %2117 = vmatprep.mubr.msk.f32.mxu0 %vm2349_vm1, %v2348_v1  ;;  %2157 = vmatpush3.msra.mxu1 %v2501_v24  ;;  %v2666_v24 = vsub.f32 %v1373_v18, %v2660_v19 }
 0x15a   : > { %2118 = vmatmul.mubr.f32.vlgmr.msra.gmra.mxu0 %v930_v13  ;;  %2135 = vmatprep.subr.mxu0 %v2348_v1 }
 0x15b   : > { %2158 = vmatprep.subr.mxu1 %v2348_v1  ;;  %2136 = vmatpush3.msra.mxu0 %v962_v32  ;;  %v1491_v27 = vand.u32 4294901760, %v2666_v24 }
 0x15c   : > { %2159 = vmatpush3.msra.mxu1 %v2503_v25  ;;  %2137 = vmatprep.subr.mxu0 %v2348_v1  ;;  %v2668_v25 = vand.u32 4294901760, %v1372_v20 }
 0x15d   : > { %2160 = vmatprep.subr.mxu1 %v2348_v1  ;;  %2138 = vmatpush3.msra.mxu0 %v969_v33  ;;  %v1492_v31 = vsub.f32 %v2666_v24, %v1491_v27 }
 0x15e   : > { %2161 = vmatpush3.msra.mxu1 %v2505_v26  ;;  %2162 = vmatprep.mubr.msk.f32.mxu1 %vm2349_vm1, %v2348_v1  ;;  %v1371_v26 = vld [vmem:[%s2806_s5 + $0x8] sm:$0xff]  ;;  %v2677_v28 = vsub.f32 %v1372_v20, %v2668_v25 }
 0x15f   : > { %2139 = vmatprep.subr.mxu0 %v2348_v1  ;;  %2163 = vmatmul.mubr.f32.vlgmr.msra.gmra.mxu1 %v929_v12  ;;  %v2679_v29 = vand.u32 4294901760, %v1371_v26  ;;  %v1493_v35 = vand.u32 4294901760, %v1492_v31 }
 0x160   : > { %2140 = vmatpush3.msra.mxu0 %v976_v34  ;;  %2147 = vmatprep.mubr.msk.f32.mxu0 %vm2349_vm1, %v2348_v1  ;;  %v1498_v32 = vand.u32 4294901760, %v2677_v28  ;;  %v2693_v34 = vand.u32 4294901760, %v1370_v30 }
 0x161   : > { %2141 = vmatprep.subr.mxu0 %v2348_v1  ;;  %2176 = vmatprep.subr.mxu1 %v2348_v1  ;;  %v2691_v33 = vsub.f32 %v1371_v26, %v2679_v29 }
 0x162   : > { %2142 = vmatpush3.msra.mxu0 %v983_v36  ;;  %2184 = vmatprep.mubr.msk.f32.mxu1 %vm2349_vm1, %v2348_v1  ;;  %v1499_v36 = vsub.f32 %v2677_v28, %v1498_v32 }
 0x163   : > { %2143 = vmatprep.subr.mxu0 %v2348_v1  ;;  %2177 = vmatpush3.msra.mxu1 %v1493_v35 }
 0x164   : > { %2144 = vmatpush3.msra.mxu0 %v990_v40  ;;  %v1505_v40 = vand.u32 4294901760, %v2691_v33  ;;  %v1500_v16 = vand.u32 4294901760, %v1499_v36  ;;  %2178 = vmatprep.subr.mxu1 %v2348_v1 }
 0x165   : > { %2145 = vmatprep.subr.mxu0 %v2348_v1 }
 0x166   : > { %2146 = vmatpush3.msra.mxu0 %v997_v44  ;;  %v2702_v44 = vsub.f32 %v1370_v30, %v2693_v34  ;;  %v1506_v17 = vsub.f32 %v2691_v33, %v1505_v40  ;;  %2179 = vmatpush3.msra.mxu1 %v1500_v16 }
 0x167   : > { %2148 = vmatmul.mubr.f32.vlgmr.msra.gmra.mxu0 %v929_v12  ;;  %2165 = vmatprep.subr.mxu0 %v2348_v1 }
 0x168   : > { %2173 = vmatprep.mubr.msk.f32.mxu0 %vm2349_vm1, %v2348_v1  ;;  %2166 = vmatpush3.msra.mxu0 %v2660_v19  ;;  %v1512_v21 = vand.u32 4294901760, %v2702_v44  ;;  %v1507_v22 = vand.u32 4294901760, %v1506_v17 }
 0x169   : > { %2167 = vmatprep.subr.mxu0 %v2348_v1  ;;  %2180 = vmatprep.subr.mxu1 %v2348_v1 }
 0x16a   : > { %2168 = vmatpush3.msra.mxu0 %v2668_v25  ;;  %v1513_v23 = vsub.f32 %v2702_v44, %v1512_v21  ;;  %2181 = vmatpush3.msra.mxu1 %v1507_v22 }
 0x16b   : > { %2169 = vmatprep.subr.mxu0 %v2348_v1  ;;  %2182 = vmatprep.subr.mxu1 %v2348_v1 }
 0x16c   : > { %2170 = vmatpush3.msra.mxu0 %v2679_v29  ;;  %v1514_v37 = vand.u32 4294901760, %v1513_v23 }
 0x16d   : > { %2171 = vmatprep.subr.mxu0 %v2348_v1 }
 0x16e   : > { %2172 = vmatpush3.msra.mxu0 %v2693_v34  ;;  %2183 = vmatpush3.msra.mxu1 %v1514_v37 }
 0x16f   : > { %2187 = vmatprep.subr.mxu0 %v2348_v1  ;;  %2198 = vmatprep.subr.mxu1 %v2348_v1 }
 0x205   : > { %v1036_v38 = vpop.f32.mrf.mxu1 }
 0x207   : > { %v2104_v39 = vpop.f32.mrf.mxu1 }
 0x20d   : > { %v935_v41 = vpop.f32.mrf.mxu0 }
 0x20e   : > { %v936_v48 = vadd.f32 %v1955_v46, %v935_v41 }
 0x20f   : > { %v2089_v42 = vpop.f32.mrf.mxu0 }
 0x210   : > { %v1037_v51 = vadd.f32 %v1036_v38, %v936_v48 }
 0x211   : > { %v1199_v43 = vpop.f32.mrf.mxu1 }
 0x213   : > { %v2134_v45 = vpop.f32.mrf.mxu1 }
 0x21a   : > { %v1120_v47 = vpop.f32.mrf.mxu0 }
 0x21b   : > { %v1121_v53 = vadd.f32 %v1120_v47, %v1037_v51 }
 0x21c   : > { %v2119_v49 = vpop.f32.mrf.mxu0 }
 0x21d   : > { %v1200_v54 = vadd.f32 %v1199_v43, %v1121_v53 }
 0x21f   : > { %v1365_v50 = vpop.f32.mrf.mxu1 }
 0x221   : > { %v2164_v52 = vpop.f32.mrf.mxu1 }
 0x227   : > { %v1288_v55 = vpop.f32.mrf.mxu0 }
 0x228   : > { %v1289_v56 = vadd.f32 %v1288_v55, %v1200_v54 }
 0x229   : > { %v2149_v57 = vpop.f32.mrf.mxu0 }
 0x22a   : > { %v1366_v58 = vadd.f32 %v1365_v50, %v1289_v56 }
 0x22c   : > { %v1369_v59 = vmax.f32 %v1366_v58, 0.0 }
 0x22e   : > { %v1383_v60 = vsel %vm1381_vm2, %v1369_v59, 0 }
 0x22f   : > { %v1454_v61 = vand.u32 4294901760, %v1383_v60 }
 0x231   : > { %v1455_v62 = vsub.f32 %v1383_v60, %v1454_v61  ;;  %2185 = vmatmul.mubr.f32.vlgmr.msra.gmra.mxu1 %v1454_v61 }
 0x232   : > { %2199 = vmatpush3.msra.mxu1 %v2660_v19  ;;  %2206 = vmatprep.mubr.msk.f32.mxu1 %vm2349_vm1, %v2348_v1 }
 0x233   : > { %2200 = vmatprep.subr.mxu1 %v2348_v1  ;;  %v1456_v63 = vand.u32 4294901760, %v1455_v62 }
 0x234   : > { %2201 = vmatpush3.msra.mxu1 %v2668_v25 }
 0x235   : > { %2202 = vmatprep.subr.mxu1 %v2348_v1  ;;  %v1457_v0 = vsub.f32 %v1455_v62, %v1456_v63 }
 0x236   : > { %2203 = vmatpush3.msra.mxu1 %v2679_v29 }
 0x237   : > { %2204 = vmatprep.subr.mxu1 %v2348_v1  ;;  %v1458_v2 = vand.u32 4294901760, %v1457_v0 }
 0x238   : > { %2205 = vmatpush3.msra.mxu1 %v2693_v34 }
 0x239   : > { %2207 = vmatmul.mubr.f32.vlgmr.msra.gmra.mxu1 %v1456_v63  ;;  %2220 = vmatprep.subr.mxu1 %v2348_v1 }
 0x23a   : > { %2174 = vmatmul.mubr.f32.vlgmr.msra.gmra.mxu0 %v1458_v2  ;;  %2221 = vmatpush3.msra.mxu1 %v2660_v19 }
 0x23b   : > { %2188 = vmatpush3.msra.mxu0 %v2666_v24  ;;  %2222 = vmatprep.subr.mxu1 %v2348_v1 }
 0x23c   : > { %2189 = vmatprep.subr.mxu0 %v2348_v1  ;;  %2223 = vmatpush3.msra.mxu1 %v2668_v25 }
 0x23d   : > { %2190 = vmatpush3.msra.mxu0 %v2677_v28  ;;  %2224 = vmatprep.subr.mxu1 %v2348_v1 }
 0x23e   : > { %2191 = vmatprep.subr.mxu0 %v2348_v1  ;;  %2225 = vmatpush3.msra.mxu1 %v2679_v29 }
 0x23f   : > { %2192 = vmatpush3.msra.mxu0 %v2691_v33  ;;  %2226 = vmatprep.subr.mxu1 %v2348_v1 }
 0x240   : > { %2193 = vmatprep.subr.mxu0 %v2348_v1  ;;  %2195 = vmatprep.mubr.msk.f32.mxu0 %vm2349_vm1, %v2348_v1 }
 0x241   : > { %2194 = vmatpush3.msra.mxu0 %v2702_v44  ;;  %2227 = vmatpush3.msra.mxu1 %v2693_v34 }
 0x242   : > { %2228 = vmatprep.mubr.msk.f32.mxu1 %vm2349_vm1, %v2348_v1  ;;  %2196 = vmatmul.mubr.f32.vlgmr.msra.gmra.mxu0 %v1455_v62 }
 0x243   : > { %2209 = vmatprep.subr.mxu0 %v2348_v1  ;;  %2229 = vmatmul.mubr.f32.vlgmr.msra.gmra.mxu1 %v1454_v61 }
 0x244   : > { %2210 = vmatpush3.msra.mxu0 %v1491_v27  ;;  %2217 = vmatprep.mubr.msk.f32.mxu0 %vm2349_vm1, %v2348_v1 }
 0x245   : > { %2211 = vmatprep.subr.mxu0 %v2348_v1 }
 0x246   : > { %2212 = vmatpush3.msra.mxu0 %v1498_v32 }
 0x247   : > { %2213 = vmatprep.subr.mxu0 %v2348_v1 }
 0x248   : > { %2214 = vmatpush3.msra.mxu0 %v1505_v40 }
 0x249   : > { %2215 = vmatprep.subr.mxu0 %v2348_v1 }
 0x24a   : > { %2216 = vmatpush3.msra.mxu0 %v1512_v21 }
 0x24b   : > { %2218 = vmatmul.mubr.f32.vlgmr.msra.gmra.mxu0 %v1454_v61 }
 0x2f1   : > { %v1551_v3 = vpop.f32.mrf.mxu1 }
 0x2f3   : > { %v2186_v4 = vpop.f32.mrf.mxu1 }
 0x2f9   : > { %v1708_v5 = vpop.f32.mrf.mxu1 }
 0x2fa   : > { %v1460_v7 = vpop.f32.mrf.mxu0 }
 0x2fb   : > { %v2208_v8 = vpop.f32.mrf.mxu1  ;;  %v1461_v10 = vadd.f32 %v1956_v9, %v1460_v7 }
 0x2fc   : > { %v2175_v11 = vpop.f32.mrf.mxu0 }
 0x2fd   : > { %v1552_v1 = vadd.f32 %v1551_v3, %v1461_v10 }
 0x302   : > { %v1631_v12 = vpop.f32.mrf.mxu0 }
 0x303   : > { %v1866_v13 = vpop.f32.mrf.mxu1  ;;  %v1632_v6 = vadd.f32 %v1631_v12, %v1552_v1 }
 0x304   : > { %v2197_v14 = vpop.f32.mrf.mxu0 }
 0x305   : > { %v2230_v15 = vpop.f32.mrf.mxu1  ;;  %v1709_v18 = vadd.f32 %v1708_v5, %v1632_v6 }
 0x30b   : > { %v1791_v19 = vpop.f32.mrf.mxu0 }
 0x30c   : > { %v1792_v20 = vadd.f32 %v1791_v19, %v1709_v18 }
 0x30d   : > { %v2219_v24 = vpop.f32.mrf.mxu0 }
 0x30e   : > { %v1867_v25 = vadd.f32 %v1866_v13, %v1792_v20 }
 0x310   : > { %1870 = vst.msk [vmem:[%s269_s21] sm:$0xff] %vm1381_vm2, %v1867_v25 }
 0x311   : > { %2299 = shalt.err (!%p2296_p3)
}
 0x312   : > { %s2300_s16 = scalar_lea.hbm %s1883_s8, 128  ;;  %s2304_s19 = scalar_lea.hbm %s2808_s7, 256 }
 0x313   : > { %p2301_p4 = scmp.ne.s32.totalorder %s1883_s8, %s2300_s16  ;;  %p2305_p9 = scmp.lt.s32.totalorder %s1883_s8, %s2808_s7 }
 0x314   : > { %p2306_p10 = scmp.lt.s32.totalorder %s2304_s19, %s2300_s16 }
 0x315   : > { %p2302_p7 = pnand %p2301_p4, %p2435_p5 }
 0x316   : > { %p2307_p11 = por %p2306_p10, %p2305_p9 }
 0x317   : > { %p2303_p8 = pneg %p2302_p7 }
 0x319   : > { %p2308_p12 = pnand %p2307_p11, %p2303_p8 }
 0x31b   : > { %2311 = shalt.err (!%p2308_p12)
}
 0x31c   : > { %2235 = dma.vmem_to_hbm [thread:$0]  (%p2435_p5), %s1886_s22, 128, %s1883_s8, %s1872_s9  }
 0x31d PF: > { %p2241_p13 = scmp.ge.s32.totalorder %s2346_s27, 2  ;;  %s1897_s23 = sand.u32 1, %s2334_s24  }
 0x31e   : > { %s1898_s29 = scalar_lea.sflag [#allocation3], %s1897_s23 }
 0x31f   : > { %p2238_p0 = pnand %p2241_p13, %p2439_p6 }
 0x321   : > { %p2239_p1 = pneg %p2238_p0 }
 0x323   : > { %2329 = dma.done.wait (%p2239_p1), %s1898_s29, 128  }
 0x324   : > { %2331 = vsyncadd (%p2239_p1), %s1898_s29, 4294967168  ;;  %p17_p2 = scmp.ge.s32.totalorder %s2422_s30, 4   ;;  %s2811_s24 = smov %s2338_s25 }
 0x325   : > { %s2812_s25 = smov %s2342_s26  ;;  %s2813_s26 = smov %s2433_s10 }
 0x326   : > { %s2814_s27 = smov %s2422_s30  ;;  %19 = sbr.rel (!%p17_p2) target bundleno = 3 (0x3), region = 83 }
 0x32b   :  { %1903 = vsyncpa [#allocation3], 1 }
 0x32c   :  { %1905 = vsyncpa [#allocation3 + $0x1], 1 }

</bundles_post_ra>
